<compile_context>
chip_gen: v6e
topology: v6e:2x2x1
jax: 0.10.0
libtpu: 0.0.40
codegen_flags: <defaults>
</compile_context>

<pallas_src>
import math
from functools import partial

import numpy as np
import jax
import jax.numpy as jnp
from jax.experimental import pallas as pl
from jax.experimental.pallas import tpu as pltpu

_MASK_VALUE = -1e30          # additive bias for off-diagonal (cross-head / cross-batch) blocks
_ROWS_PER_STEP_CAP = 512     # cap on batch_block*seq rows per grid step (vreg/VMEM pressure)


def mha_mean_kernel(x_ref, w_qkv_t_ref, b_qkv_ref, w_o_t_ref, b_o_ref,
                    bias_ref, sel_ref, qmask_ref, hmask_ref, o_ref,
                    *, num_heads, seq_len, matmul_dtype):
    rows, E = x_ref.shape                     # rows = batch_block * seq_len
    bt = rows // seq_len
    H = num_heads
    md = matmul_dtype

    # Fused QKV projection; 1/sqrt(Dh) is pre-folded into the Q columns / Q bias.
    qkv = jnp.dot(x_ref[...].astype(md), w_qkv_t_ref[...].astype(md),
                  preferred_element_type=jnp.float32) + b_qkv_ref[...]       # (rows, 3E) f32

    q = qkv[:, :E]
    k = qkv[:, E:2 * E]
    v = qkv[:, 2 * E:]

    # Stack every (head, batch) group along sublanes (group order = (head, batch, seq)):
    # pure sublane copies, no per-head lane compaction.  The precomputed per-row head mask
    # keeps only that group's head columns of Q, which makes the score matmul block-exact.
    q_wide = jnp.concatenate([q] * H, axis=0) * qmask_ref[...]                # (N, E)
    k_wide = jnp.concatenate([k] * H, axis=0)                                 # (N, E)
    v_wide = jnp.concatenate([v] * H, axis=0)                                 # (N, E)

    # One block-diagonal score matrix for all (head, batch) groups; the additive bias kills
    # every cross-head / cross-batch block.
    s = jnp.einsum('re,ke->rk', q_wide.astype(md), k_wide.astype(md),
                   preferred_element_type=jnp.float32)                        # (N, N)
    s = s + bias_ref[...]

    # One softmax over every query row of every group (all f32; exact reciprocal).
    s = s - jnp.max(s, axis=-1, keepdims=True)
    p = jnp.exp(s)
    p = p * (1.0 / jnp.sum(p, axis=-1, keepdims=True))

    # Query-sum per group as one matmul (the 1/seq_len mean is folded into w_o_t).
    p_sum = jnp.dot(sel_ref[...], p, preferred_element_type=jnp.float32)      # (G, N)

    # PV and out-projection, one matmul each; hmask keeps each group's head columns so the
    # head concat + out_proj collapses into a single (G,E)@(E,E) matmul.
    hv = jnp.dot(p_sum.astype(md), v_wide.astype(md),
                 preferred_element_type=jnp.float32) * hmask_ref[...]         # (G, E)
    hv_o = jnp.dot(hv.astype(md), w_o_t_ref[...].astype(md),
                   preferred_element_type=jnp.float32)                        # (G, E)

    # Fold heads: out[b] = out_proj.bias + sum_h hv_o[h*bt + b]
    out = b_o_ref[...]                                                         # (1, E)
    for h in range(H):
        out = out + hv_o[h * bt:(h + 1) * bt, :]
    o_ref[...] = out.astype(o_ref.dtype)


def _default_batch_block(batch, seq_len):
    cap = max(1, _ROWS_PER_STEP_CAP // seq_len)
    if batch <= cap:
        return batch
    return max(d for d in range(1, cap + 1) if batch % d == 0)


def attention_block_forward(x, w_qkv, b_qkv, w_o, b_o, *, num_heads,
                            batch_block=None, matmul_dtype=jnp.float32):
    B, S, E = x.shape
    assert E % num_heads == 0
    Dh = E // num_heads

    if batch_block is None:
        batch_block = _default_batch_block(B, S)
    assert B % batch_block == 0
    if batch_block != B:
        # (8,128) rule: row-blocked x / out specs need sublane-multiple blocks.
        assert (batch_block * S) % 8 == 0 and batch_block % 8 == 0, \
            "batch_block (and batch_block*seq) must be a multiple of 8 unless == batch"

    bt = batch_block
    G = num_heads * bt                        # (head, batch) groups per grid step
    N = G * S                                  # stacked rows per grid step

    # ---- trace-time constant prep (folded scales, transposed weights, hoisted masks) ----
    scale = 1.0 / math.sqrt(Dh)
    w_qkv_t = jnp.transpose(w_qkv)                                             # (E, 3E)
    w_qkv_t = jnp.concatenate([w_qkv_t[:, :E] * scale, w_qkv_t[:, E:]], axis=1)
    b_qkv2 = jnp.concatenate([b_qkv[:E] * scale, b_qkv[E:]]).reshape(1, 3 * E)
    w_o_t = jnp.transpose(w_o) * (1.0 / S)                                     # fold query mean
    b_o2 = b_o.reshape(1, E)

    gid = np.arange(N) // S                    # group id of each stacked row
    hid = gid // bt                            # head id of each stacked row
    col_head = np.arange(E) // Dh              # head id of each embedding column
    bias = np.where(gid[:, None] == gid[None, :], 0.0, _MASK_VALUE).astype(np.float32)   # (N, N)
    sel = (np.arange(G)[:, None] == gid[None, :]).astype(np.float32)                      # (G, N)
    qmask = (col_head[None, :] == hid[:, None]).astype(np.float32)                        # (N, E)
    hmask = (col_head[None, :] == (np.arange(G) // bt)[:, None]).astype(np.float32)       # (G, E)

    x2 = x.reshape(B * S, E)
    grid = (B // batch_block,)

    out = pl.pallas_call(
        partial(mha_mean_kernel, num_heads=num_heads, seq_len=S, matmul_dtype=matmul_dtype),
        out_shape=jax.ShapeDtypeStruct((B, E), x.dtype),
        grid_spec=pltpu.PrefetchScalarGridSpec(
            num_scalar_prefetch=0,
            grid=grid,
            in_specs=[
                pl.BlockSpec((bt * S, E), lambda i: (i, 0)),      # x rows for this step
                pl.BlockSpec((E, 3 * E), lambda i: (0, 0)),       # in_proj_weight.T (Q scaled)
                pl.BlockSpec((1, 3 * E), lambda i: (0, 0)),       # in_proj_bias (Q scaled)
                pl.BlockSpec((E, E), lambda i: (0, 0)),           # out_proj.weight.T / S
                pl.BlockSpec((1, E), lambda i: (0, 0)),           # out_proj.bias
                pl.BlockSpec((N, N), lambda i: (0, 0)),           # additive block-diag mask
                pl.BlockSpec((G, N), lambda i: (0, 0)),           # query-sum selector
                pl.BlockSpec((N, E), lambda i: (0, 0)),           # per-row head mask (Q)
                pl.BlockSpec((G, E), lambda i: (0, 0)),           # per-group head mask (PV)
            ],
            out_specs=pl.BlockSpec((bt, E), lambda i: (i, 0)),
        ),
        compiler_params=pltpu.CompilerParams(dimension_semantics=("parallel",)),
    )(x2, w_qkv_t, b_qkv2, w_o_t, b_o2,
      jnp.asarray(bias), jnp.asarray(sel), jnp.asarray(qmask), jnp.asarray(hmask))
    return out


def xavier_uniform(key, shape):
    # matches torch.nn.init.xavier_uniform_ for a 2D weight (fan_out, fan_in)
    fan_out, fan_in = shape
    limit = math.sqrt(6.0 / (fan_in + fan_out))
    return jax.random.uniform(key, shape, jnp.float32, minval=-limit, maxval=limit)


def reference_forward(x, w_qkv, b_qkv, w_o, b_o, *, num_heads):
    # pure-JAX reference mirroring torch.nn.MultiheadAttention + mean(dim=1)
    B, S, E = x.shape
    Dh = E // num_heads
    qkv = x @ w_qkv.T + b_qkv
    q, k, v = jnp.split(qkv, 3, axis=-1)
    split = lambda t: t.reshape(B, S, num_heads, Dh).transpose(0, 2, 1, 3)
    q, k, v = split(q), split(k), split(v)
    s = jnp.einsum("bhqd,bhkd->bhqk", q, k) / math.sqrt(Dh)
    p = jax.nn.softmax(s, axis=-1)
    o = jnp.einsum("bhqk,bhkd->bhqd", p, v).transpose(0, 2, 1, 3).reshape(B, S, E)
    o = o @ w_o.T + b_o
    return o.mean(axis=1)


if __name__ == "__main__":
    # config['model']['lstm_hidden_size'] = 16 -> embed_dim = 32
    # config['model']['attention_heads'] = 4
    B, S = 2, 8
    lstm_hidden_size = 16
    num_heads = 4
    E = lstm_hidden_size * 2

    key = jax.random.PRNGKey(0)
    k_x, k_w_in, k_w_out = jax.random.split(key, 3)

    x = jax.random.normal(k_x, (B, S, E), dtype=jnp.float32)

    # deterministic init mirroring the module's __init__ (xavier_uniform weights, zero bias)
    w_qkv = xavier_uniform(k_w_in, (3 * E, E))     # in_proj_weight
    b_qkv = jnp.zeros((3 * E,), jnp.float32)       # in_proj_bias
    w_o = xavier_uniform(k_w_out, (E, E))          # out_proj.weight
    b_o = jnp.zeros((E,), jnp.float32)             # out_proj.bias

    ref = reference_forward(x, w_qkv, b_qkv, w_o, b_o, num_heads=num_heads)

    # f32 path: tight parity (exact softmax reciprocal, only summation-order differences)
    out = attention_block_forward(x, w_qkv, b_qkv, w_o, b_o, num_heads=num_heads)
    out = jax.block_until_ready(out)
    assert out.shape == (B, E)
    assert jnp.allclose(out, ref, atol=1e-4, rtol=1e-4), "f32 kernel mismatch vs JAX reference"

    # bf16 MXU-operand path (f32 accumulation, f32 softmax) — loose bound reflects bf16
    # (2^-8) operand rounding through two matmul layers; the f32 check above is the tight one.
    out_bf16 = attention_block_forward(x, w_qkv, b_qkv, w_o, b_o, num_heads=num_heads,
                                       matmul_dtype=jnp.bfloat16)
    out_bf16 = jax.block_until_ready(out_bf16)
    assert jnp.allclose(out_bf16, ref, atol=8e-2, rtol=8e-2), "bf16 kernel mismatch"

    print("KERNEL_OK")
</pallas_src>

<mosaic_0001>
module attributes {stable_mosaic.version = 11 : i64} {
  func.func @mha_mean_kernel(%arg0: i32, %arg1: memref<16x32xf32, #tpu.memory_space<vmem>>, %arg2: memref<32x96xf32, #tpu.memory_space<vmem>>, %arg3: memref<1x96xf32, #tpu.memory_space<vmem>>, %arg4: memref<32x32xf32, #tpu.memory_space<vmem>>, %arg5: memref<1x32xf32, #tpu.memory_space<vmem>>, %arg6: memref<64x64xf32, #tpu.memory_space<vmem>>, %arg7: memref<8x64xf32, #tpu.memory_space<vmem>>, %arg8: memref<64x32xf32, #tpu.memory_space<vmem>>, %arg9: memref<8x32xf32, #tpu.memory_space<vmem>>, %arg10: memref<2x32xf32, #tpu.memory_space<vmem>>) attributes {dimension_semantics = [#tpu.dimension_semantics<parallel>], iteration_bounds = array<i64: 1>, scalar_prefetch = 0 : i64, scratch_operands = 0 : i64, tpu.core_type = #tpu.core_type<tc>, window_params = [{transform_indices = @transform_0, window_bounds = array<i64: 16, 32>}, {pipeline_mode = #tpu.pipeline_mode<synchronous>, transform_indices = @transform_1, window_bounds = array<i64: 32, 96>}, {pipeline_mode = #tpu.pipeline_mode<synchronous>, transform_indices = @transform_2, window_bounds = array<i64: 1, 96>}, {pipeline_mode = #tpu.pipeline_mode<synchronous>, transform_indices = @transform_3, window_bounds = array<i64: 32, 32>}, {pipeline_mode = #tpu.pipeline_mode<synchronous>, transform_indices = @transform_4, window_bounds = array<i64: 1, 32>}, {pipeline_mode = #tpu.pipeline_mode<synchronous>, transform_indices = @transform_5, window_bounds = array<i64: 64, 64>}, {pipeline_mode = #tpu.pipeline_mode<synchronous>, transform_indices = @transform_6, window_bounds = array<i64: 8, 64>}, {pipeline_mode = #tpu.pipeline_mode<synchronous>, transform_indices = @transform_7, window_bounds = array<i64: 64, 32>}, {pipeline_mode = #tpu.pipeline_mode<synchronous>, transform_indices = @transform_8, window_bounds = array<i64: 8, 32>}, {transform_indices = @transform_9, window_bounds = array<i64: 2, 32>}]} {
    %c0 = arith.constant 0 : index
    %c0_0 = arith.constant 0 : index
    %0 = vector.load %arg1[%c0, %c0_0] : memref<16x32xf32, #tpu.memory_space<vmem>>, vector<16x32xf32>
    %c0_1 = arith.constant 0 : index
    %c0_2 = arith.constant 0 : index
    %1 = vector.load %arg2[%c0_1, %c0_2] : memref<32x96xf32, #tpu.memory_space<vmem>>, vector<32x96xf32>
    %cst = arith.constant dense<0.000000e+00> : vector<16x96xf32>
    %2 = tpu.matmul %0, %1, %cst {dimension_numbers = #tpu.dot_dimension_numbers<[1], [0], [0], [1], [0, 0, 1, 1], [], []>} : vector<16x32xf32>, vector<32x96xf32>, vector<16x96xf32> -> vector<16x96xf32>
    %c0_3 = arith.constant 0 : index
    %c0_4 = arith.constant 0 : index
    %3 = vector.load %arg3[%c0_3, %c0_4] : memref<1x96xf32, #tpu.memory_space<vmem>>, vector<1x96xf32>
    %4 = vector.broadcast %3 : vector<1x96xf32> to vector<16x96xf32>
    %5 = arith.addf %2, %4 : vector<16x96xf32>
    %6 = vector.extract_strided_slice %5 {offsets = [0, 0], sizes = [16, 32], strides = [1, 1]} : vector<16x96xf32> to vector<16x32xf32>
    %7 = vector.extract_strided_slice %5 {offsets = [0, 32], sizes = [16, 32], strides = [1, 1]} : vector<16x96xf32> to vector<16x32xf32>
    %8 = vector.extract_strided_slice %5 {offsets = [0, 64], sizes = [16, 32], strides = [1, 1]} : vector<16x96xf32> to vector<16x32xf32>
    %9 = tpu.concatenate %6, %6, %6, %6 in 0 : vector<16x32xf32>, vector<16x32xf32>, vector<16x32xf32>, vector<16x32xf32> -> vector<64x32xf32>
    %c0_5 = arith.constant 0 : index
    %c0_6 = arith.constant 0 : index
    %10 = vector.load %arg8[%c0_5, %c0_6] : memref<64x32xf32, #tpu.memory_space<vmem>>, vector<64x32xf32>
    %11 = arith.mulf %9, %10 : vector<64x32xf32>
    %12 = tpu.concatenate %7, %7, %7, %7 in 0 : vector<16x32xf32>, vector<16x32xf32>, vector<16x32xf32>, vector<16x32xf32> -> vector<64x32xf32>
    %13 = tpu.concatenate %8, %8, %8, %8 in 0 : vector<16x32xf32>, vector<16x32xf32>, vector<16x32xf32>, vector<16x32xf32> -> vector<64x32xf32>
    "tpu.trace_start"() <{level = 10 : i32, message = "re,ke->rk"}> : () -> ()
    %cst_7 = arith.constant dense<0.000000e+00> : vector<64x64xf32>
    %14 = tpu.matmul %11, %12, %cst_7 {dimension_numbers = #tpu.dot_dimension_numbers<[1], [1], [0], [0], [0, 0, 1, 0], [], []>} : vector<64x32xf32>, vector<64x32xf32>, vector<64x64xf32> -> vector<64x64xf32>
    "tpu.trace_stop"() : () -> ()
    %c0_8 = arith.constant 0 : index
    %c0_9 = arith.constant 0 : index
    %15 = vector.load %arg6[%c0_8, %c0_9] : memref<64x64xf32, #tpu.memory_space<vmem>>, vector<64x64xf32>
    %16 = arith.addf %14, %15 : vector<64x64xf32>
    %cst_10 = arith.constant dense<0xFF800000> : vector<64xf32>
    %17 = vector.multi_reduction <maximumf>, %16, %cst_10 [1] : vector<64x64xf32> to vector<64xf32>
    %18 = vector.shape_cast %17 : vector<64xf32> to vector<64x1xf32>
    %19 = vector.broadcast %18 : vector<64x1xf32> to vector<64x64xf32>
    %20 = arith.subf %16, %19 : vector<64x64xf32>
    %21 = math.exp %20 : vector<64x64xf32>
    %cst_11 = arith.constant dense<0.000000e+00> : vector<64xf32>
    %22 = vector.multi_reduction <add>, %21, %cst_11 [1] : vector<64x64xf32> to vector<64xf32>
    %23 = vector.shape_cast %22 : vector<64xf32> to vector<64x1xf32>
    %cst_12 = arith.constant 1.000000e+00 : f32
    %24 = vector.broadcast %cst_12 : f32 to vector<64x1xf32>
    %25 = arith.divf %24, %23 : vector<64x1xf32>
    %26 = vector.broadcast %25 : vector<64x1xf32> to vector<64x64xf32>
    %27 = arith.mulf %21, %26 : vector<64x64xf32>
    %c0_13 = arith.constant 0 : index
    %c0_14 = arith.constant 0 : index
    %28 = vector.load %arg7[%c0_13, %c0_14] : memref<8x64xf32, #tpu.memory_space<vmem>>, vector<8x64xf32>
    %cst_15 = arith.constant dense<0.000000e+00> : vector<8x64xf32>
    %29 = tpu.matmul %28, %27, %cst_15 {dimension_numbers = #tpu.dot_dimension_numbers<[1], [0], [0], [1], [0, 0, 1, 1], [], []>} : vector<8x64xf32>, vector<64x64xf32>, vector<8x64xf32> -> vector<8x64xf32>
    %cst_16 = arith.constant dense<0.000000e+00> : vector<8x32xf32>
    %30 = tpu.matmul %29, %13, %cst_16 {dimension_numbers = #tpu.dot_dimension_numbers<[1], [0], [0], [1], [0, 0, 1, 1], [], []>} : vector<8x64xf32>, vector<64x32xf32>, vector<8x32xf32> -> vector<8x32xf32>
    %c0_17 = arith.constant 0 : index
    %c0_18 = arith.constant 0 : index
    %31 = vector.load %arg9[%c0_17, %c0_18] : memref<8x32xf32, #tpu.memory_space<vmem>>, vector<8x32xf32>
    %32 = arith.mulf %30, %31 : vector<8x32xf32>
    %c0_19 = arith.constant 0 : index
    %c0_20 = arith.constant 0 : index
    %33 = vector.load %arg4[%c0_19, %c0_20] : memref<32x32xf32, #tpu.memory_space<vmem>>, vector<32x32xf32>
    %cst_21 = arith.constant dense<0.000000e+00> : vector<8x32xf32>
    %34 = tpu.matmul %32, %33, %cst_21 {dimension_numbers = #tpu.dot_dimension_numbers<[1], [0], [0], [1], [0, 0, 1, 1], [], []>} : vector<8x32xf32>, vector<32x32xf32>, vector<8x32xf32> -> vector<8x32xf32>
    %c0_22 = arith.constant 0 : index
    %c0_23 = arith.constant 0 : index
    %35 = vector.load %arg5[%c0_22, %c0_23] : memref<1x32xf32, #tpu.memory_space<vmem>>, vector<1x32xf32>
    %36 = vector.extract_strided_slice %34 {offsets = [0, 0], sizes = [2, 32], strides = [1, 1]} : vector<8x32xf32> to vector<2x32xf32>
    %37 = vector.broadcast %35 : vector<1x32xf32> to vector<2x32xf32>
    %38 = arith.addf %37, %36 : vector<2x32xf32>
    %39 = vector.extract_strided_slice %34 {offsets = [2, 0], sizes = [2, 32], strides = [1, 1]} : vector<8x32xf32> to vector<2x32xf32>
    %40 = arith.addf %38, %39 : vector<2x32xf32>
    %41 = vector.extract_strided_slice %34 {offsets = [4, 0], sizes = [2, 32], strides = [1, 1]} : vector<8x32xf32> to vector<2x32xf32>
    %42 = arith.addf %40, %41 : vector<2x32xf32>
    %43 = vector.extract_strided_slice %34 {offsets = [6, 0], sizes = [2, 32], strides = [1, 1]} : vector<8x32xf32> to vector<2x32xf32>
    %44 = arith.addf %42, %43 : vector<2x32xf32>
    %c0_24 = arith.constant 0 : index
    %c0_25 = arith.constant 0 : index
    %45 = vector.load %arg10[%c0_24, %c0_25] : memref<2x32xf32, #tpu.memory_space<vmem>>, vector<2x32xf32>
    tpu.vector_store %arg10[%c0_24, %c0_25], %44 {strides = array<i32>} : memref<2x32xf32, #tpu.memory_space<vmem>>, vector<2x32xf32>,
    return
  }
  func.func @transform_0(%arg0: i32) -> (i32, i32) {
    %c0_i32 = arith.constant 0 : i32
    %c0_i32_0 = arith.constant 0 : i32
    return %arg0, %c0_i32 : i32, i32
  }
  func.func @transform_1(%arg0: i32) -> (i32, i32) {
    %c0_i32 = arith.constant 0 : i32
    %c0_i32_0 = arith.constant 0 : i32
    %c0_i32_1 = arith.constant 0 : i32
    return %c0_i32, %c0_i32_0 : i32, i32
  }
  func.func @transform_2(%arg0: i32) -> (i32, i32) {
    %c0_i32 = arith.constant 0 : i32
    %c0_i32_0 = arith.constant 0 : i32
    %c0_i32_1 = arith.constant 0 : i32
    return %c0_i32, %c0_i32_0 : i32, i32
  }
  func.func @transform_3(%arg0: i32) -> (i32, i32) {
    %c0_i32 = arith.constant 0 : i32
    %c0_i32_0 = arith.constant 0 : i32
    %c0_i32_1 = arith.constant 0 : i32
    return %c0_i32, %c0_i32_0 : i32, i32
  }
  func.func @transform_4(%arg0: i32) -> (i32, i32) {
    %c0_i32 = arith.constant 0 : i32
    %c0_i32_0 = arith.constant 0 : i32
    %c0_i32_1 = arith.constant 0 : i32
    return %c0_i32, %c0_i32_0 : i32, i32
  }
  func.func @transform_5(%arg0: i32) -> (i32, i32) {
    %c0_i32 = arith.constant 0 : i32
    %c0_i32_0 = arith.constant 0 : i32
    %c0_i32_1 = arith.constant 0 : i32
    return %c0_i32, %c0_i32_0 : i32, i32
  }
  func.func @transform_6(%arg0: i32) -> (i32, i32) {
    %c0_i32 = arith.constant 0 : i32
    %c0_i32_0 = arith.constant 0 : i32
    %c0_i32_1 = arith.constant 0 : i32
    return %c0_i32, %c0_i32_0 : i32, i32
  }
  func.func @transform_7(%arg0: i32) -> (i32, i32) {
    %c0_i32 = arith.constant 0 : i32
    %c0_i32_0 = arith.constant 0 : i32
    %c0_i32_1 = arith.constant 0 : i32
    return %c0_i32, %c0_i32_0 : i32, i32
  }
  func.func @transform_8(%arg0: i32) -> (i32, i32) {
    %c0_i32 = arith.constant 0 : i32
    %c0_i32_0 = arith.constant 0 : i32
    %c0_i32_1 = arith.constant 0 : i32
    return %c0_i32, %c0_i32_0 : i32, i32
  }
  func.func @transform_9(%arg0: i32) -> (i32, i32) {
    %c0_i32 = arith.constant 0 : i32
    %c0_i32_0 = arith.constant 0 : i32
    return %arg0, %c0_i32 : i32, i32
  }
}

</mosaic_0001>

<bundles_post_ra>
// kernel: tpu_custom_call.1
= control target key start
LH: loop header
LB: loop body
LE: loop exit
PB: predicated region body
PF: predicated region fallthrough
CT: control target
= control target key end

     0   :  { %14 = vsyncpa [#allocation3], 0  ;;  %s1248_s0 = inlined_call_operand.hbm [shape: f32[16,32], index: 0, kind: input, shape index: {}]   ;;  %s1249_s1 = inlined_call_operand.vmem [shape: f32[32,96], index: 1, kind: input, shape index: {}]   ;;  %s1250_s2 = inlined_call_operand.vmem [shape: f32[1,96], index: 2, kind: input, shape index: {}]   ;;  %s1251_s3 = inlined_call_operand.hbm [shape: f32[32,32], index: 3, kind: input, shape index: {}]   ;;  %s1252_s4 = inlined_call_operand.hbm [shape: f32[1,32], index: 4, kind: input, shape index: {}]   ;;  %s1253_s5 = inlined_call_operand.vmem [shape: f32[64,64], index: 5, kind: input, shape index: {}]   ;;  %s1254_s6 = inlined_call_operand.vmem [shape: f32[8,64], index: 6, kind: input, shape index: {}]   ;;  %s1255_s7 = inlined_call_operand.vmem [shape: f32[64,32], index: 7, kind: input, shape index: {}]   ;;  %s1256_s8 = inlined_call_operand.hbm [shape: f32[8,32], index: 8, kind: input, shape index: {}]   ;;  %s1257_s9 = inlined_call_operand.hbm [shape: f32[2,32], index: 9, kind: output, shape index: {}]  }
   0x1   :  { %15 = vsyncpa [#allocation6], 0 }
   0x2   :  { %16 = vsyncpa [#allocation9], 0 }
   0x3   :  { %17 = vsyncpa [#allocation4], 0  ;;  %s1015_s30 = smov [#allocation5]   ;;  %s1016_s11 = smov [#allocation2]  }
   0x4   :  { %s39_s10 = sshll.u32 %s1015_s30, 4  ;;  %s23_s12 = sshll.u32 %s1016_s11, 4  ;;  %s40_s10 = int_to_ptr.vmem [resolvable:$true] %s39_s10  ;;  %s24_s12 = int_to_ptr.vmem [resolvable:$true] %s23_s12 }
   0x5   :  { %s915_s13 = scalar_lea.vmem %s40_s10, 512  ;;  %p920_p1 = scmp.lt.s32.totalorder %s40_s10, %s40_s10 }
   0x6   :  { %p916_p0 = scmp.ne.s32.totalorder %s40_s10, %s915_s13  ;;  %p921_p2 = scmp.lt.s32.totalorder %s915_s13, %s915_s13 }
   0x8   :  { %p922_p3 = por %p921_p2, %p920_p1 }
   0xa   :  { %p923_p4 = pnand %p922_p3, %p916_p0 }
   0xc   :  { %926 = shalt.err (!%p923_p4)
}
   0xd   :  { %s1017_s14 = smov 128   ;;  %s1018_s15 = smov 8  }
   0xe   :  { %45 = dma.hbm_to_vmem [thread:$0]  %s1251_s3, 512, %s40_s10, [#allocation6], %s1017_s14, %s1017_s14, %s1018_s15  }
   0xf   :  { %s935_s18 = scalar_lea.vmem %s24_s12, 256  ;;  %p940_p6 = scmp.lt.s32.totalorder %s24_s12, %s24_s12 }
  0x10   :  { %p936_p5 = scmp.ne.s32.totalorder %s24_s12, %s935_s18  ;;  %p941_p7 = scmp.lt.s32.totalorder %s935_s18, %s935_s18 }
  0x12   :  { %p942_p8 = por %p941_p7, %p940_p6 }
  0x14   :  { %p943_p9 = pnand %p942_p8, %p936_p5 }
  0x16   :  { %946 = shalt.err (!%p943_p9)
}
  0x17   :  { %29 = dma.hbm_to_vmem [thread:$0]  %s1248_s0, 256, %s24_s12, [#allocation3], %s1017_s14, %s1017_s14, %s1018_s15  }
  0x18   :  { %s1019_s21 = smov [#allocation7]   ;;  %s1020_s23 = smov [#allocation8]  }
  0x19   :  { %s52_s22 = sshll.u32 %s1019_s21, 4  ;;  %s68_s24 = sshll.u32 %s1020_s23, 4  ;;  %s53_s22 = int_to_ptr.vmem [resolvable:$true] %s52_s22  ;;  %s69_s24 = int_to_ptr.vmem [resolvable:$true] %s68_s24 }
  0x1a   :  { %s955_s25 = scalar_lea.vmem %s53_s22, 16  ;;  %s959_s3 = scalar_lea.vmem %s53_s22, 32 }
  0x1b   :  { %p956_p10 = scmp.ne.s32.totalorder %s53_s22, %s955_s25  ;;  %p960_p11 = scmp.lt.s32.totalorder %s53_s22, %s53_s22 }
  0x1c   :  { %p961_p12 = scmp.lt.s32.totalorder %s959_s3, %s955_s25 }
  0x1e   :  { %p962_p13 = por %p961_p12, %p960_p11 }
  0x20   :  { %p963_p0 = pnand %p962_p13, %p956_p10 }
  0x22   :  { %966 = shalt.err (!%p963_p0)
}
  0x23   :  { %55 = dma.hbm_to_vmem [thread:$0]  %s1252_s4, 16, %s53_s22, [#allocation6]  }
  0x24   :  { %s975_s28 = scalar_lea.vmem %s69_s24, 128  ;;  %p980_p2 = scmp.lt.s32.totalorder %s69_s24, %s69_s24 }
  0x25   :  { %p976_p1 = scmp.ne.s32.totalorder %s69_s24, %s975_s28  ;;  %p981_p3 = scmp.lt.s32.totalorder %s975_s28, %s975_s28 }
  0x27   :  { %p982_p4 = por %p981_p3, %p980_p2 }
  0x29   :  { %p983_p5 = pnand %p982_p4, %p976_p1 }
  0x2b   :  { %986 = shalt.err (!%p983_p5)
}
  0x2c   :  { %71 = dma.hbm_to_vmem [thread:$0]  %s1256_s8, 128, %s69_s24, [#allocation9]  }
  0x2d   :  { %1007 = dma.done.wait [#allocation3], 256  }
  0x2e   :  { %1008 = vsyncadd [#allocation3], 4294967040 }
  0x2f   :  { %1009 = dma.done.wait [#allocation6], 528  }
  0x30   :  { %1010 = vsyncadd [#allocation6], 4294966768 }
  0x31   :  { %1011 = dma.done.wait [#allocation9], 128  }
  0x32   :  { %1012 = vsyncadd [#allocation9], 4294967168  ;;  %vm97_vm0 = vcmask 261120   ;;  %v89_v0 = vld [vmem:[%s1249_s1 + $0x18] sm:$0xff]  ;;  %v88_v1 = vld [vmem:[%s1249_s1 + $0x10] sm:$0xff]  ;;  %vm342_vm1 = vcmask 523264  }
  0x33   :  { %776 = vmatprep.subr.mxu0 %v89_v0  ;;  %v84_v2 = vld [vmem:[#allocation2] sm:$0xff]  ;;  %v87_v3 = vld [vmem:[%s1249_s1 + $0x8] sm:$0xff]  ;;  %v181_v16 = vld [vmem:[%s1255_s7 + $0x10] sm:$0xff]  ;;  %vm1024_vm2 = vmmov 0   ;;  %vm689_vm3 = vcmask 254976  }
  0x34   :  { %777 = vmatpush3.msra.mxu0 %v89_v0  ;;  %784 = vmatprep.mubr.msk.f32.mxu0 %vm97_vm0, %v84_v2  ;;  %v86_v4 = vld [vmem:[%s1249_s1] sm:$0xff]  ;;  %v85_v5 = vld [vmem:[#allocation2 + $0x8] sm:$0xff]  ;;  %s1021_s1 = smov 96   ;;  %v182_v19 = vld [vmem:[%s1255_s7 + $0x18] sm:$0xff] }
  0x35   :  { %778 = vmatprep.subr.mxu0 %v88_v1  ;;  %v708_v6 = vld [vmem:[%s1250_s2] ss:$0 sm:$0xff]  ;;  %v180_v15 = vld [vmem:[%s1255_s7 + $0x8] sm:$0xff]  ;;  %v185_v24 = vld [vmem:[%s1255_s7 + $0x30] sm:$0xff] }
  0x36   :  { %779 = vmatpush3.msra.mxu0 %v88_v1  ;;  %v179_v10 = vld [vmem:[%s1255_s7] sm:$0xff]  ;;  %v184_v23 = vld [vmem:[%s1255_s7 + $0x28] sm:$0xff]  ;;  %v186_v27 = vld [vmem:[%s1255_s7 + $0x38] sm:$0xff] }
  0x37   :  { %780 = vmatprep.subr.mxu0 %v87_v3  ;;  %v183_v20 = vld [vmem:[%s1255_s7 + $0x20] sm:$0xff]  ;;  %v198_v31 = vld [vmem:[%s1253_s5 + $0x18] sm:$0xff]  ;;  %v200_v35 = vld [vmem:[%s1253_s5 + $0x28] sm:$0xff] }
  0x38   :  { %781 = vmatpush3.msra.mxu0 %v87_v3  ;;  %v199_v38 = vld [vmem:[%s1253_s5 + $0x20] sm:$0xff]  ;;  %v202_v41 = vld [vmem:[%s1253_s5 + $0x38] sm:$0xff]  ;;  %v201_v48 = vld [vmem:[%s1253_s5 + $0x30] sm:$0xff] }
  0x39   :  { %782 = vmatprep.subr.mxu0 %v86_v4  ;;  %v197_v51 = vld [vmem:[%s1253_s5 + $0x10] sm:$0xff]  ;;  %v196_v54 = vld [vmem:[%s1253_s5 + $0x8] sm:$0xff]  ;;  %v195_v57 = vld [vmem:[%s1253_s5] sm:$0xff]  ;;  %s1023_s5 = smov 64  }
  0x3a   :  { %783 = vmatpush3.msra.mxu0 %v86_v4 }
  0x3b   :  { %785 = vmatmul.mubr.msk.f32.vlgmr.msra.gmra.mxu0 %vm97_vm0, %v85_v5 }
  0xfb   :  { %v786_v7 = vpop.f32.mrf.mxu0 }
  0xfc   :  { %v1105_v8 = vadd.f32 %v786_v7, %v708_v6 }
  0xfd   :  { %v170_v9 = vpop.f32.mrf.mxu0 }
  0xfe   :  { %v1110_v11 = vadd.f32 %v708_v6, %v170_v9  ;;  %207 = vrot.lane.b32.xlu0 %v1105_v8, %s1021_s1  ;;  %v188_v17 = vmul.f32 %v180_v15, %v1105_v8  ;;  %v190_v21 = vmul.f32 %v182_v19, %v1105_v8  ;;  %v192_v25 = vmul.f32 %v184_v23, %v1105_v8 }
  0xff   :  { %v194_v28 = vmul.f32 %v186_v27, %v1105_v8 }
 0x100   :  { %v187_v12 = vmul.f32 %v179_v10, %v1110_v11  ;;  %v189_v18 = vmul.f32 %v181_v16, %v1110_v11  ;;  %v191_v22 = vmul.f32 %v183_v20, %v1110_v11  ;;  %v193_v26 = vmul.f32 %v185_v24, %v1110_v11 }
 0x102   :  { %205 = vrot.lane.b32.xlu0 %v1110_v11, %s1021_s1  ;;  %803 = vmatprep.mubr.msk.f32.mxu1 %vm97_vm0, %v187_v12 }
 0x170   :  { %v208_v13 = vpop.permute.xlu0 %207 }
 0x171   :  { %787 = vmatprep.subr.msk.mxu1 %vm97_vm0, %v208_v13 }
 0x172   :  { %788 = vmatpush3.xpose.msk.msra.mxu1 %vm97_vm0, %v208_v13 }
 0x174   :  { %v206_v14 = vpop.permute.xlu0 %205 }
 0x175   :  { %789 = vmatprep.subr.msk.mxu1 %vm97_vm0, %v206_v14 }
 0x176   :  { %790 = vmatpush3.xpose.msk.msra.mxu1 %vm97_vm0, %v206_v14 }
 0x177   :  { %791 = vmatprep.subr.msk.mxu1 %vm97_vm0, %v208_v13 }
 0x17a   :  { %792 = vmatpush3.xpose.msk.msra.mxu1 %vm97_vm0, %v208_v13 }
 0x17b   :  { %793 = vmatprep.subr.msk.mxu1 %vm97_vm0, %v206_v14 }
 0x17e   :  { %794 = vmatpush3.xpose.msk.msra.mxu1 %vm97_vm0, %v206_v14 }
 0x17f   :  { %795 = vmatprep.subr.msk.mxu1 %vm97_vm0, %v208_v13 }
 0x182   :  { %796 = vmatpush3.xpose.msk.msra.mxu1 %vm97_vm0, %v208_v13 }
 0x183   :  { %797 = vmatprep.subr.msk.mxu1 %vm97_vm0, %v206_v14 }
 0x186   :  { %798 = vmatpush3.xpose.msk.msra.mxu1 %vm97_vm0, %v206_v14 }
 0x187   :  { %799 = vmatprep.subr.msk.mxu1 %vm97_vm0, %v208_v13 }
 0x18a   :  { %800 = vmatpush3.xpose.msk.msra.mxu1 %vm97_vm0, %v208_v13 }
 0x18b   :  { %801 = vmatprep.subr.msk.mxu1 %vm97_vm0, %v206_v14 }
 0x18e   :  { %802 = vmatpush3.xpose.msk.msra.mxu1 %vm97_vm0, %v206_v14 }
 0x191   :  { %804 = vmatmul.mubr.msk.f32.vlgmr.msra.gmra.mxu1 %vm97_vm0, %v188_v17 }
 0x192   :  { %806 = vmatprep.mubr.msk.f32.mxu1 %vm97_vm0, %v189_v18 }
 0x195   :  { %807 = vmatmul.mubr.msk.f32.gmra.mxu1 %vm97_vm0, %v190_v21 }
 0x196   :  { %809 = vmatprep.mubr.msk.f32.mxu1 %vm97_vm0, %v191_v22 }
 0x199   :  { %810 = vmatmul.mubr.msk.f32.gmra.mxu1 %vm97_vm0, %v192_v25 }
 0x19a   :  { %812 = vmatprep.mubr.msk.f32.mxu1 %vm97_vm0, %v193_v26 }
 0x19d   :  { %813 = vmatmul.mubr.msk.f32.gmra.mxu1 %vm97_vm0, %v194_v28 }
 0x251   :  { %v805_v29 = vpop.f32.mrf.mxu1 }
 0x252   :  { %v309_v55 = vadd.f32 %v805_v29, %v196_v54 }
 0x253   :  { %v303_v30 = vpop.f32.mrf.mxu1 }
 0x254   :  { %v304_v58 = vadd.f32 %v303_v30, %v195_v57  ;;  %v346_v59 = vsel %vm342_vm1, %v309_v55, -inf }
 0x255   :  { %v808_v32 = vpop.f32.mrf.mxu1 }
 0x256   :  { %v319_v33 = vadd.f32 %v808_v32, %v198_v31  ;;  %v343_v60 = vsel %vm342_vm1, %v304_v58, -inf }
 0x257   :  { %v313_v34 = vpop.f32.mrf.mxu1 }
 0x258   :  { %v352_v36 = vsel %vm342_vm1, %v319_v33, -inf  ;;  %v314_v52 = vadd.f32 %v313_v34, %v197_v51 }
 0x259   :  { %353 = vmax.xlane.f32.xlu1 %v352_v36  ;;  %v811_v37 = vpop.f32.mrf.mxu1 }
 0x25a   :  { %v329_v39 = vadd.f32 %v811_v37, %v200_v35  ;;  %v349_v56 = vsel %vm342_vm1, %v314_v52, -inf }
 0x25b   :  { %v323_v40 = vpop.f32.mrf.mxu1 }
 0x25c   :  { %v324_v42 = vadd.f32 %v323_v40, %v199_v38  ;;  %v358_v43 = vsel %vm342_vm1, %v329_v39, -inf }
 0x25d   :  { %359 = vmax.xlane.f32.xlu0 %v358_v43  ;;  %v814_v44 = vpop.f32.mrf.mxu1 }
 0x25e   :  { %v339_v45 = vadd.f32 %v814_v44, %v202_v41  ;;  %v355_v46 = vsel %vm342_vm1, %v324_v42, -inf }
 0x25f   :  { %v333_v47 = vpop.f32.mrf.mxu1  ;;  %356 = vmax.xlane.f32.xlu1 %v355_v46 }
 0x260   :  { %v334_v49 = vadd.f32 %v333_v47, %v201_v48  ;;  %v364_v50 = vsel %vm342_vm1, %v339_v45, -inf }
 0x262   :  { %v361_v53 = vsel %vm342_vm1, %v334_v49, -inf }
 0x263   :  { %365 = vmax.xlane.f32.xlu1 %v364_v50 }
 0x267   :  { %362 = vmax.xlane.f32.xlu1 %v361_v53 }
 0x26b   :  { %350 = vmax.xlane.f32.xlu1 %v349_v56 }
 0x26f   :  { %347 = vmax.xlane.f32.xlu1 %v346_v59 }
 0x273   :  { %344 = vmax.xlane.f32.xlu1 %v343_v60 }
 0x2e2   :  { %v354_v61 = vpop.xlane.xlu1 %353 }
 0x2e3   :  { %v370_v9 = vsub.f32 %v319_v33, %v354_v61 }
 0x2e5   :  { %v381_v15 = vmul.f32 1.442695, %v370_v9 }
 0x2e6   :  { %v360_v1 = vpop.xlane.xlu0 %359 }
 0x2e7   :  { %v372_v4 = vsub.f32 %v329_v39, %v360_v1  ;;  %v1022_v39 = vmov 0.0   ;;  %v597_v1 = vld [vmem:[#allocation5 + $0x18] sm:$0xff] }
 0x2e8   :  { %v357_v62 = vpop.xlane.xlu1 %356  ;;  %815 = vmatprep.subr.mxu0 %v1022_v39  ;;  %831 = vmatprep.mubr.msk.f32.mxu0 %vm1024_vm2, %v1022_v39 }
 0x2e9   :  { %v371_v63 = vsub.f32 %v324_v42, %v357_v62  ;;  %v385_v10 = vmul.f32 1.442695, %v372_v4  ;;  %v439_v62 = vld [vmem:[%s1254_s6] sm:$0xff]  ;;  %s1025_s6 = smov [#allocation10]  }
 0x2ea   :  { %s697_s22 = sshll.u32 %s1025_s6, 4  ;;  %s698_s22 = int_to_ptr.vmem [resolvable:$true] %s697_s22 }
 0x2eb   :  { %v383_v0 = vmul.f32 1.442695, %v371_v63  ;;  %s987_s23 = scalar_lea.vmem %s698_s22, 32  ;;  %p992_p7 = scmp.lt.s32.totalorder %s698_s22, %s698_s22 }
 0x2ec   :  { %v366_v2 = vpop.xlane.xlu1 %365  ;;  %p988_p6 = scmp.ne.s32.totalorder %s698_s22, %s987_s23  ;;  %p993_p8 = scmp.lt.s32.totalorder %s987_s23, %s987_s23 }
 0x2ed   :  { %875 = vpow2.f32 %v383_v0  ;;  %v374_v3 = vsub.f32 %v339_v45, %v366_v2 }
 0x2ee   :  { %p994_p9 = por %p993_p8, %p992_p7 }
 0x2ef   :  { %v389_v5 = vmul.f32 1.442695, %v374_v3  ;;  %v596_v3 = vld [vmem:[#allocation5 + $0x10] sm:$0xff] }
 0x2f0   :  { %v363_v6 = vpop.xlane.xlu1 %362  ;;  %p995_p10 = pnand %p994_p9, %p988_p6 }
 0x2f1   :  { %877 = vpow2.f32 %v389_v5  ;;  %v373_v7 = vsub.f32 %v334_v49, %v363_v6  ;;  %v595_v5 = vld [vmem:[#allocation5 + $0x8] sm:$0xff]  ;;  %v594_v6 = vld [vmem:[#allocation5] sm:$0xff] }
 0x2f3   :  { %v387_v12 = vmul.f32 1.442695, %v373_v7  ;;  %v592_v7 = vld [vmem:[#allocation8] sm:$0xff] }
 0x2f4   :  { %v351_v13 = vpop.xlane.xlu1 %350 }
 0x2f5   :  { %879 = vpow2.f32 %v387_v12  ;;  %v369_v14 = vsub.f32 %v314_v52, %v351_v13  ;;  %v730_v13 = vld [vmem:[#allocation7] ss:$0 sm:$0xff] }
 0x2f6   :  { %881 = vpow2.f32 %v385_v10 }
 0x2f7   :  { %v379_v16 = vmul.f32 1.442695, %v369_v14 }
 0x2f8   :  { %v348_v17 = vpop.xlane.xlu1 %347 }
 0x2f9   :  { %883 = vpow2.f32 %v379_v16  ;;  %v368_v18 = vsub.f32 %v309_v55, %v348_v17 }
 0x2fa   :  { %v1199_v19 = vpop.eup %875  ;;  %885 = vpow2.f32 %v381_v15 }
 0x2fb   :  { %v377_v20 = vmul.f32 1.442695, %v368_v18  ;;  %v403_v21 = vsel %vm342_vm1, %v1199_v19, 0.0 }
 0x2fc   :  { %404 = vadd.xlane.f32.xlu0 %v403_v21  ;;  %v345_v22 = vpop.xlane.xlu1 %344 }
 0x2fd   :  { %v367_v23 = vsub.f32 %v304_v58, %v345_v22  ;;  %887 = vpow2.f32 %v377_v20 }
 0x2fe   :  { %v878_v24 = vpop.eup %877 }
 0x2ff   :  { %v375_v25 = vmul.f32 1.442695, %v367_v23  ;;  %v412_v26 = vsel %vm342_vm1, %v878_v24, 0.0 }
 0x300   :  { %413 = vadd.xlane.f32.xlu1 %v412_v26 }
 0x301   :  { %889 = vpow2.f32 %v375_v25 }
 0x302   :  { %v880_v27 = vpop.eup %879 }
 0x303   :  { %v409_v28 = vsel %vm342_vm1, %v880_v27, 0.0  ;;  %v882_v29 = vpop.eup %881 }
 0x304   :  { %410 = vadd.xlane.f32.xlu1 %v409_v28  ;;  %v406_v32 = vsel %vm342_vm1, %v882_v29, 0.0 }
 0x306   :  { %v884_v30 = vpop.eup %883 }
 0x307   :  { %v397_v31 = vsel %vm342_vm1, %v884_v30, 0.0  ;;  %v886_v33 = vpop.eup %885 }
 0x308   :  { %398 = vadd.xlane.f32.xlu0 %v397_v31  ;;  %407 = vadd.xlane.f32.xlu1 %v406_v32  ;;  %v400_v34 = vsel %vm342_vm1, %v886_v33, 0.0 }
 0x30a   :  { %v888_v35 = vpop.eup %887 }
 0x30b   :  { %v394_v37 = vsel %vm342_vm1, %v888_v35, 0.0 }
 0x30c   :  { %401 = vadd.xlane.f32.xlu1 %v400_v34 }
 0x30e   :  { %v890_v36 = vpop.eup %889 }
 0x30f   :  { %v391_v38 = vsel %vm342_vm1, %v890_v36, 0.0 }
 0x310   :  { %395 = vadd.xlane.f32.xlu1 %v394_v37  ;;  %392 = vadd.xlane.f32.xlu0 %v391_v38 }
 0x321   :  { %515 = vrot.lane.b32.xlu1 %v1105_v8, %s1023_s5 }
 0x326   :  { %513 = vrot.lane.b32.xlu0 %v1110_v11, %s1023_s5 }
 0x385   :  { %v405_v42 = vpop.xlane.xlu0 %404 }
 0x389   :  { %v414_v40 = vpop.xlane.xlu1 %413 }
 0x38a   :  { %891 = vrcp.f32 %v414_v40 }
 0x38d   :  { %v411_v41 = vpop.xlane.xlu1 %410 }
 0x38e   :  { %893 = vrcp.f32 %v411_v41 }
 0x38f   :  { %895 = vrcp.f32 %v405_v42 }
 0x391   :  { %v408_v43 = vpop.xlane.xlu1 %407  ;;  %v399_v44 = vpop.xlane.xlu0 %398 }
 0x392   :  { %897 = vrcp.f32 %v408_v43 }
 0x395   :  { %v402_v45 = vpop.xlane.xlu1 %401 }
 0x396   :  { %899 = vrcp.f32 %v402_v45 }
 0x397   :  { %v892_v46 = vpop.eup %891  ;;  %901 = vrcp.f32 %v399_v44 }
 0x398   :  { %v438_v8 = vmul.f32 %v892_v46, %v878_v24 }
 0x399   :  { %v393_v47 = vpop.xlane.xlu0 %392  ;;  %v396_v11 = vpop.xlane.xlu1 %395 }
 0x39a   :  { %903 = vrcp.f32 %v393_v47  ;;  %816 = vmatpush3.msra.mxu0 %v438_v8 }
 0x39b   :  { %v894_v48 = vpop.eup %893  ;;  %905 = vrcp.f32 %v396_v11  ;;  %817 = vmatprep.subr.mxu0 %v1022_v39 }
 0x39c   :  { %v437_v49 = vmul.f32 %v894_v48, %v880_v27  ;;  %v896_v50 = vpop.eup %895 }
 0x39d   :  { %v435_v54 = vmul.f32 %v896_v50, %v1199_v19  ;;  %v516_v63 = vpop.permute.xlu1 %515  ;;  %v514_v0 = vpop.permute.xlu0 %513 }
 0x39e   :  { %818 = vmatpush3.msra.mxu0 %v437_v49 }
 0x39f   :  { %819 = vmatprep.subr.mxu0 %v1022_v39  ;;  %v898_v51 = vpop.eup %897 }
 0x3a0   :  { %v436_v52 = vmul.f32 %v898_v51, %v882_v29 }
 0x3a2   :  { %820 = vmatpush3.msra.mxu0 %v436_v52 }
 0x3a3   :  { %v900_v53 = vpop.eup %899  ;;  %821 = vmatprep.subr.mxu0 %v1022_v39 }
 0x3a4   :  { %v902_v55 = vpop.eup %901  ;;  %v434_v56 = vmul.f32 %v900_v53, %v886_v33  ;;  %822 = vmatpush3.msra.mxu0 %v435_v54 }
 0x3a5   :  { %823 = vmatprep.subr.mxu0 %v1022_v39  ;;  %v433_v58 = vmul.f32 %v902_v55, %v884_v30 }
 0x3a6   :  { %824 = vmatpush3.msra.mxu0 %v434_v56 }
 0x3a7   :  { %v904_v57 = vpop.eup %903  ;;  %825 = vmatprep.subr.mxu0 %v1022_v39 }
 0x3a8   :  { %v906_v59 = vpop.eup %905  ;;  %826 = vmatpush3.msra.mxu0 %v433_v58  ;;  %v431_v61 = vmul.f32 %v904_v57, %v890_v36 }
 0x3a9   :  { %v432_v60 = vmul.f32 %v906_v59, %v888_v35  ;;  %827 = vmatprep.subr.mxu0 %v1022_v39 }
 0x3ab   :  { %828 = vmatpush3.msra.mxu0 %v432_v60 }
 0x3ac   :  { %829 = vmatprep.subr.mxu0 %v1022_v39 }
 0x3ad   :  { %830 = vmatpush3.msra.mxu0 %v431_v61 }
 0x3ae   :  { %832 = vmatmul.mubr.msk.f32.vlgmr.msra.gmra.mxu0 %vm342_vm1, %v439_v62  ;;  %834 = vmatprep.subr.mxu0 %v1022_v39 }
 0x3af   :  { %835 = vmatpush3.msra.mxu0 %v516_v63  ;;  %850 = vmatprep.mubr.msk.f32.mxu0 %vm1024_vm2, %v1022_v39 }
 0x3b0   :  { %836 = vmatprep.subr.mxu0 %v1022_v39 }
 0x3b1   :  { %837 = vmatpush3.msra.mxu0 %v514_v0 }
 0x3b2   :  { %838 = vmatprep.subr.mxu0 %v1022_v39 }
 0x3b3   :  { %839 = vmatpush3.msra.mxu0 %v516_v63 }
 0x3b4   :  { %840 = vmatprep.subr.mxu0 %v1022_v39 }
 0x3b5   :  { %841 = vmatpush3.msra.mxu0 %v514_v0 }
 0x3b6   :  { %842 = vmatprep.subr.mxu0 %v1022_v39 }
 0x3b7   :  { %843 = vmatpush3.msra.mxu0 %v516_v63 }
 0x3b8   :  { %844 = vmatprep.subr.mxu0 %v1022_v39 }
 0x3b9   :  { %845 = vmatpush3.msra.mxu0 %v514_v0 }
 0x3ba   :  { %846 = vmatprep.subr.mxu0 %v1022_v39 }
 0x3bb   :  { %847 = vmatpush3.msra.mxu0 %v516_v63 }
 0x3bc   :  { %848 = vmatprep.subr.mxu0 %v1022_v39 }
 0x3bd   :  { %849 = vmatpush3.msra.mxu0 %v514_v0 }
 0x3be   :  { %853 = vmatprep.subr.mxu0 %v1022_v39 }
 0x46e   :  { %v509_v2 = vpop.f32.mrf.mxu0 }
 0x46f   :  { %851 = vmatmul.mubr.msk.f32.vlgmr.msra.gmra.mxu0 %vm342_vm1, %v509_v2 }
 0x470   :  { %v833_v4 = vpop.f32.mrf.mxu0  ;;  %854 = vmatpush3.msra.mxu0 %v597_v1  ;;  %861 = vmatprep.mubr.msk.f32.mxu0 %vm1024_vm2, %v1022_v39 }
 0x471   :  { %855 = vmatprep.subr.mxu0 %v1022_v39 }
 0x472   :  { %856 = vmatpush3.msra.mxu0 %v596_v3 }
 0x473   :  { %857 = vmatprep.subr.mxu0 %v1022_v39 }
 0x474   :  { %858 = vmatpush3.msra.mxu0 %v595_v5 }
 0x475   :  { %859 = vmatprep.subr.mxu0 %v1022_v39 }
 0x476   :  { %860 = vmatpush3.msra.mxu0 %v594_v6 }
 0x52f   :  { %v588_v9 = vpop.f32.mrf.mxu0 }
 0x530   :  { %v593_v10 = vmul.f32 %v592_v7, %v588_v9 }
 0x531   :  { %v852_v12 = vpop.f32.mrf.mxu0 }
 0x532   :  { %862 = vmatmul.mubr.msk.f32.vlgmr.msra.gmra.mxu0 %vm97_vm0, %v593_v10 }
 0x5f2   :  { %v667_v14 = vpop.f32.mrf.mxu0 }
 0x5f3   :  { %v678_v15 = vadd.f32 %v730_v13, %v667_v14  ;;  %v680_v16 = vrot.slane %v667_v14, 2  ;;  %v683_v19 = vrot.slane %v667_v14, 4  ;;  %v686_v21 = vrot.slane %v667_v14, 6 }
 0x5f4   :  { %v863_v17 = vpop.f32.mrf.mxu0 }
 0x5f5   :  { %v682_v18 = vadd.f32 %v680_v16, %v678_v15 }
 0x5f7   :  { %v685_v20 = vadd.f32 %v683_v19, %v682_v18 }
 0x5f9   :  { %v688_v22 = vadd.f32 %v686_v21, %v685_v20 }
 0x5fb   :  { %690 = vst.msk [vmem:[#allocation10] sm:$0x3] %vm689_vm3, %v688_v22 }
 0x5fc   :  { %998 = shalt.err (!%p995_p10)
}
 0x5fd   :  { %700 = dma.vmem_to_hbm [thread:$0]  %s698_s22, 32, %s1257_s9, [#allocation4]  }
 0x5fe   :  { %1013 = dma.done.wait [#allocation4], 32  }
 0x5ff   :  { %1014 = vsyncadd [#allocation4], 4294967264 }
 0x600   :  { %704 = vsyncpa [#allocation3], 1 }
 0x601   :  { %705 = vsyncpa [#allocation6], 1 }
 0x602   :  { %706 = vsyncpa [#allocation9], 1 }
 0x603   :  { %707 = vsyncpa [#allocation4], 1 }

</bundles_post_ra>
